<compile_context>
chip_gen: v6e
topology: v6e:2x2x1
jax: 0.10.0
libtpu: 0.0.40
codegen_flags: <defaults>
</compile_context>

<pallas_src>
import functools

import numpy as np
import jax
import jax.numpy as jnp
from jax.experimental import pallas as pl
from jax.experimental.pallas import tpu as pltpu


def entity_classifier_kernel(p2i_row_ref, p2i_tile_ref, gh_ref, gt_ref,
                             lh_ref, lt_ref, w1_ref, b1_ref, w2_ref, b2_ref,
                             out_ref, *, hs, num_class):
    pp = pl.program_id(1)                    # P-tile index (reduction / "arbitrary" axis)

    # ---- per-path MLP on this P-tile -------------------------------------------------
    p2i = p2i_row_ref[...]                                                  # (TP, I)
    gh = jnp.dot(p2i, gh_ref[...], preferred_element_type=jnp.float32)      # (TP, hs)
    gt = jnp.dot(p2i, gt_ref[...], preferred_element_type=jnp.float32)      # (TP, hs)
    lh = lh_ref[...]                                                        # (TP, hs)
    lt = lt_ref[...]                                                        # (TP, hs)

    def w1_blk(k):
        # static, sublane-aligned row-block of the resident (8*hs, 2*hs) weight
        return w1_ref[k * hs:(k + 1) * hs, :]

    # concat-free x @ W1 with x = [head, tail, |head-tail|, head*tail],
    # head = [lh, gh], tail = [lt, gt]: accumulate 8 partial dots instead of
    # materializing the (TP, 8*hs) activation.
    acc = jnp.dot(lh, w1_blk(0), preferred_element_type=jnp.float32)
    acc += jnp.dot(gh, w1_blk(1), preferred_element_type=jnp.float32)
    acc += jnp.dot(lt, w1_blk(2), preferred_element_type=jnp.float32)
    acc += jnp.dot(gt, w1_blk(3), preferred_element_type=jnp.float32)
    acc += jnp.dot(jnp.abs(lh - lt), w1_blk(4), preferred_element_type=jnp.float32)
    acc += jnp.dot(jnp.abs(gh - gt), w1_blk(5), preferred_element_type=jnp.float32)
    acc += jnp.dot(lh * lt, w1_blk(6), preferred_element_type=jnp.float32)
    acc += jnp.dot(gh * gt, w1_blk(7), preferred_element_type=jnp.float32)

    h = jnp.maximum(acc + b1_ref[...], 0.0)                                 # (TP, 2hs)
    logits = jnp.dot(h, w2_ref[...], preferred_element_type=jnp.float32) + b2_ref[...]
    pred = jax.nn.sigmoid(logits)                                           # (TP, C)

    # ---- masked max-pool over paths; running max across P-tiles ----------------------
    @pl.when(pp == 0)
    def _():
        out_ref[...] = jnp.full(out_ref.shape, -jnp.inf, out_ref.dtype)

    p2i_t = p2i_tile_ref[...]                                               # (TP, TI)
    for c in range(num_class):                      # C is tiny -> static unroll
        masked = p2i_t * pred[:, c:c + 1]                                   # (TP, TI)
        row = jnp.max(masked, axis=0, keepdims=True)                        # (1, TI)
        out_ref[c:c + 1, :] = jnp.maximum(out_ref[c:c + 1, :], row)


def _pick_tile(n, candidates):
    for c in candidates:
        if c <= n and n % c == 0:
            return c
    return n


def entity_classifier(path2ins, global_head, global_tail,
                      local_head, local_tail, params,
                      *, tile_p=None, tile_i=None):
    P, I = path2ins.shape
    hs = global_head.shape[1]
    C = params["w2"].shape[1]

    # P-tile: multiple of 8 sublanes (or full P); I-tile: multiple of 128 lanes (or full I).
    TP = tile_p if tile_p is not None else _pick_tile(P, (256, 128, 64, 32, 16, 8))
    if tile_i is not None:
        TI = tile_i
    else:
        TI = _pick_tile(I, (512, 256, 128)) if I % 128 == 0 else I
    assert P % TP == 0 and I % TI == 0

    grid = (I // TI, P // TP)        # (parallel over instance tiles, arbitrary over path tiles)

    kernel = functools.partial(entity_classifier_kernel, hs=hs, num_class=C)
    resident = lambda i, p: (0, 0)

    grid_spec = pltpu.PrefetchScalarGridSpec(
        num_scalar_prefetch=0,
        grid=grid,
        in_specs=[
            pl.BlockSpec((TP, I), lambda i, p: (p, 0)),     # path2ins row-block (full I, gather)
            pl.BlockSpec((TP, TI), lambda i, p: (p, i)),    # path2ins tile (mask for max-pool)
            pl.BlockSpec((I, hs), resident),                # global_head (resident)
            pl.BlockSpec((I, hs), resident),                # global_tail (resident)
            pl.BlockSpec((TP, hs), lambda i, p: (p, 0)),    # local_head
            pl.BlockSpec((TP, hs), lambda i, p: (p, 0)),    # local_tail
            pl.BlockSpec((8 * hs, 2 * hs), resident),       # W1 (resident)
            pl.BlockSpec((1, 2 * hs), resident),            # b1
            pl.BlockSpec((2 * hs, C), resident),            # W2
            pl.BlockSpec((1, C), resident),                 # b2
        ],
        out_specs=pl.BlockSpec((C, TI), lambda i, p: (0, i)),
    )

    out_t = pl.pallas_call(
        kernel,
        out_shape=jax.ShapeDtypeStruct((C, I), jnp.float32),
        grid_spec=grid_spec,
        compiler_params=pltpu.CompilerParams(
            dimension_semantics=("parallel", "arbitrary")),
    )(path2ins, path2ins, global_head, global_tail, local_head, local_tail,
      params["w1"], params["b1"], params["w2"], params["b2"])

    # Kernel emits lane-dense (C, I); transpose back to (I, C) outside the kernel.
    return out_t.T


def reference(path2ins, global_head, global_tail, local_head, local_tail, params):
    gh = path2ins @ global_head
    gt = path2ins @ global_tail
    head = jnp.concatenate([local_head, gh], axis=-1)
    tail = jnp.concatenate([local_tail, gt], axis=-1)
    x = jnp.concatenate([head, tail, jnp.abs(head - tail), head * tail], axis=-1)
    h = jnp.maximum(x @ params["w1"] + params["b1"], 0.0)
    pred = jax.nn.sigmoid(h @ params["w2"] + params["b2"])
    masked = pred[None, :, :] * jnp.transpose(path2ins)[:, :, None]
    return jnp.max(masked, axis=1)


def init_params(key, hs, num_class):
    # mimics nn.Linear default init (uniform +/- 1/sqrt(fan_in)), deterministic
    indim1 = 8 * hs          # MLP receives cat([h, t, |h-t|, h*t]) of (P, 2hs) reps
    out1 = 2 * hs
    k1, k2, k3, k4 = jax.random.split(key, 4)
    b1lim = 1.0 / np.sqrt(indim1)
    b2lim = 1.0 / np.sqrt(out1)
    w1 = jax.random.uniform(k1, (indim1, out1), jnp.float32, -b1lim, b1lim)
    b1 = jax.random.uniform(k2, (1, out1), jnp.float32, -b1lim, b1lim)
    w2 = jax.random.uniform(k3, (out1, num_class), jnp.float32, -b2lim, b2lim)
    b2 = jax.random.uniform(k4, (1, num_class), jnp.float32, -b2lim, b2lim)
    return {"w1": w1, "b1": b1, "w2": w2, "b2": b2}


if __name__ == "__main__":
    hs = 32          # hidden size
    P = 32           # number of paths
    I = 16           # number of instances
    C = 4            # num_class

    key = jax.random.PRNGKey(0)
    kp, kgh, kgt, klh, klt, kw = jax.random.split(key, 6)

    # path -> instance membership matrix (0/1)
    path2ins = (jax.random.uniform(kp, (P, I)) < 0.4).astype(jnp.float32)
    global_head = jax.random.normal(kgh, (I, hs), jnp.float32)
    global_tail = jax.random.normal(kgt, (I, hs), jnp.float32)
    local_head = jax.random.normal(klh, (P, hs), jnp.float32)
    local_tail = jax.random.normal(klt, (P, hs), jnp.float32)

    params = init_params(kw, hs, C)

    # tile_p=8 -> grid (1, 4): exercises the running-max accumulation across P-tiles.
    out = entity_classifier(path2ins, global_head, global_tail,
                            local_head, local_tail, params, tile_p=8)
    out = jax.block_until_ready(out)

    ref = reference(path2ins, global_head, global_tail,
                    local_head, local_tail, params)

    assert out.shape == (I, C), out.shape
    np.testing.assert_allclose(np.asarray(out), np.asarray(ref), rtol=1e-5, atol=1e-5)
    print("KERNEL_OK")
</pallas_src>

<mosaic_0001>
module attributes {stable_mosaic.version = 11 : i64} {
  func.func @entity_classifier_kernel(%arg0: i32, %arg1: i32, %arg2: memref<8x16xf32, #tpu.memory_space<vmem>>, %arg3: memref<8x16xf32, #tpu.memory_space<vmem>>, %arg4: memref<16x32xf32, #tpu.memory_space<vmem>>, %arg5: memref<16x32xf32, #tpu.memory_space<vmem>>, %arg6: memref<8x32xf32, #tpu.memory_space<vmem>>, %arg7: memref<8x32xf32, #tpu.memory_space<vmem>>, %arg8: memref<256x64xf32, #tpu.memory_space<vmem>>, %arg9: memref<1x64xf32, #tpu.memory_space<vmem>>, %arg10: memref<64x4xf32, #tpu.memory_space<vmem>>, %arg11: memref<1x4xf32, #tpu.memory_space<vmem>>, %arg12: memref<4x16xf32, #tpu.memory_space<vmem>>) attributes {dimension_semantics = [#tpu.dimension_semantics<parallel>, #tpu.dimension_semantics<arbitrary>], iteration_bounds = array<i64: 1, 4>, scalar_prefetch = 0 : i64, scratch_operands = 0 : i64, tpu.core_type = #tpu.core_type<tc>, window_params = [{transform_indices = @transform_0, window_bounds = array<i64: 8, 16>}, {transform_indices = @transform_1, window_bounds = array<i64: 8, 16>}, {pipeline_mode = #tpu.pipeline_mode<synchronous>, transform_indices = @transform_2, window_bounds = array<i64: 16, 32>}, {pipeline_mode = #tpu.pipeline_mode<synchronous>, transform_indices = @transform_3, window_bounds = array<i64: 16, 32>}, {transform_indices = @transform_4, window_bounds = array<i64: 8, 32>}, {transform_indices = @transform_5, window_bounds = array<i64: 8, 32>}, {pipeline_mode = #tpu.pipeline_mode<synchronous>, transform_indices = @transform_6, window_bounds = array<i64: 256, 64>}, {pipeline_mode = #tpu.pipeline_mode<synchronous>, transform_indices = @transform_7, window_bounds = array<i64: 1, 64>}, {pipeline_mode = #tpu.pipeline_mode<synchronous>, transform_indices = @transform_8, window_bounds = array<i64: 64, 4>}, {pipeline_mode = #tpu.pipeline_mode<synchronous>, transform_indices = @transform_9, window_bounds = array<i64: 1, 4>}, {transform_indices = @transform_10, window_bounds = array<i64: 4, 16>}]} {
    %c0 = arith.constant 0 : index
    %c0_0 = arith.constant 0 : index
    %0 = vector.load %arg2[%c0, %c0_0] : memref<8x16xf32, #tpu.memory_space<vmem>>, vector<8x16xf32>
    %c0_1 = arith.constant 0 : index
    %c0_2 = arith.constant 0 : index
    %1 = vector.load %arg4[%c0_1, %c0_2] : memref<16x32xf32, #tpu.memory_space<vmem>>, vector<16x32xf32>
    %cst = arith.constant dense<0.000000e+00> : vector<8x32xf32>
    %2 = tpu.matmul %0, %1, %cst {dimension_numbers = #tpu.dot_dimension_numbers<[1], [0], [0], [1], [0, 0, 1, 1], [], []>} : vector<8x16xf32>, vector<16x32xf32>, vector<8x32xf32> -> vector<8x32xf32>
    %c0_3 = arith.constant 0 : index
    %c0_4 = arith.constant 0 : index
    %3 = vector.load %arg5[%c0_3, %c0_4] : memref<16x32xf32, #tpu.memory_space<vmem>>, vector<16x32xf32>
    %cst_5 = arith.constant dense<0.000000e+00> : vector<8x32xf32>
    %4 = tpu.matmul %0, %3, %cst_5 {dimension_numbers = #tpu.dot_dimension_numbers<[1], [0], [0], [1], [0, 0, 1, 1], [], []>} : vector<8x16xf32>, vector<16x32xf32>, vector<8x32xf32> -> vector<8x32xf32>
    %c0_6 = arith.constant 0 : index
    %c0_7 = arith.constant 0 : index
    %5 = vector.load %arg6[%c0_6, %c0_7] : memref<8x32xf32, #tpu.memory_space<vmem>>, vector<8x32xf32>
    %c0_8 = arith.constant 0 : index
    %c0_9 = arith.constant 0 : index
    %6 = vector.load %arg7[%c0_8, %c0_9] : memref<8x32xf32, #tpu.memory_space<vmem>>, vector<8x32xf32>
    %c0_10 = arith.constant 0 : index
    %c0_11 = arith.constant 0 : index
    %7 = vector.load %arg8[%c0_10, %c0_11] : memref<256x64xf32, #tpu.memory_space<vmem>>, vector<32x64xf32>
    %cst_12 = arith.constant dense<0.000000e+00> : vector<8x64xf32>
    %8 = tpu.matmul %5, %7, %cst_12 {dimension_numbers = #tpu.dot_dimension_numbers<[1], [0], [0], [1], [0, 0, 1, 1], [], []>} : vector<8x32xf32>, vector<32x64xf32>, vector<8x64xf32> -> vector<8x64xf32>
    %c32 = arith.constant 32 : index
    %c0_13 = arith.constant 0 : index
    %9 = vector.load %arg8[%c32, %c0_13] : memref<256x64xf32, #tpu.memory_space<vmem>>, vector<32x64xf32>
    %cst_14 = arith.constant dense<0.000000e+00> : vector<8x64xf32>
    %10 = tpu.matmul %2, %9, %cst_14 {dimension_numbers = #tpu.dot_dimension_numbers<[1], [0], [0], [1], [0, 0, 1, 1], [], []>} : vector<8x32xf32>, vector<32x64xf32>, vector<8x64xf32> -> vector<8x64xf32>
    %11 = arith.addf %8, %10 : vector<8x64xf32>
    %c64 = arith.constant 64 : index
    %c0_15 = arith.constant 0 : index
    %12 = vector.load %arg8[%c64, %c0_15] : memref<256x64xf32, #tpu.memory_space<vmem>>, vector<32x64xf32>
    %cst_16 = arith.constant dense<0.000000e+00> : vector<8x64xf32>
    %13 = tpu.matmul %6, %12, %cst_16 {dimension_numbers = #tpu.dot_dimension_numbers<[1], [0], [0], [1], [0, 0, 1, 1], [], []>} : vector<8x32xf32>, vector<32x64xf32>, vector<8x64xf32> -> vector<8x64xf32>
    %14 = arith.addf %11, %13 : vector<8x64xf32>
    %c96 = arith.constant 96 : index
    %c0_17 = arith.constant 0 : index
    %15 = vector.load %arg8[%c96, %c0_17] : memref<256x64xf32, #tpu.memory_space<vmem>>, vector<32x64xf32>
    %cst_18 = arith.constant dense<0.000000e+00> : vector<8x64xf32>
    %16 = tpu.matmul %4, %15, %cst_18 {dimension_numbers = #tpu.dot_dimension_numbers<[1], [0], [0], [1], [0, 0, 1, 1], [], []>} : vector<8x32xf32>, vector<32x64xf32>, vector<8x64xf32> -> vector<8x64xf32>
    %17 = arith.addf %14, %16 : vector<8x64xf32>
    %18 = arith.subf %5, %6 : vector<8x32xf32>
    %19 = math.absf %18 : vector<8x32xf32>
    %c128 = arith.constant 128 : index
    %c0_19 = arith.constant 0 : index
    %20 = vector.load %arg8[%c128, %c0_19] : memref<256x64xf32, #tpu.memory_space<vmem>>, vector<32x64xf32>
    %cst_20 = arith.constant dense<0.000000e+00> : vector<8x64xf32>
    %21 = tpu.matmul %19, %20, %cst_20 {dimension_numbers = #tpu.dot_dimension_numbers<[1], [0], [0], [1], [0, 0, 1, 1], [], []>} : vector<8x32xf32>, vector<32x64xf32>, vector<8x64xf32> -> vector<8x64xf32>
    %22 = arith.addf %17, %21 : vector<8x64xf32>
    %23 = arith.subf %2, %4 : vector<8x32xf32>
    %24 = math.absf %23 : vector<8x32xf32>
    %c160 = arith.constant 160 : index
    %c0_21 = arith.constant 0 : index
    %25 = vector.load %arg8[%c160, %c0_21] : memref<256x64xf32, #tpu.memory_space<vmem>>, vector<32x64xf32>
    %cst_22 = arith.constant dense<0.000000e+00> : vector<8x64xf32>
    %26 = tpu.matmul %24, %25, %cst_22 {dimension_numbers = #tpu.dot_dimension_numbers<[1], [0], [0], [1], [0, 0, 1, 1], [], []>} : vector<8x32xf32>, vector<32x64xf32>, vector<8x64xf32> -> vector<8x64xf32>
    %27 = arith.addf %22, %26 : vector<8x64xf32>
    %28 = arith.mulf %5, %6 : vector<8x32xf32>
    %c192 = arith.constant 192 : index
    %c0_23 = arith.constant 0 : index
    %29 = vector.load %arg8[%c192, %c0_23] : memref<256x64xf32, #tpu.memory_space<vmem>>, vector<32x64xf32>
    %cst_24 = arith.constant dense<0.000000e+00> : vector<8x64xf32>
    %30 = tpu.matmul %28, %29, %cst_24 {dimension_numbers = #tpu.dot_dimension_numbers<[1], [0], [0], [1], [0, 0, 1, 1], [], []>} : vector<8x32xf32>, vector<32x64xf32>, vector<8x64xf32> -> vector<8x64xf32>
    %31 = arith.addf %27, %30 : vector<8x64xf32>
    %32 = arith.mulf %2, %4 : vector<8x32xf32>
    %c224 = arith.constant 224 : index
    %c0_25 = arith.constant 0 : index
    %33 = vector.load %arg8[%c224, %c0_25] : memref<256x64xf32, #tpu.memory_space<vmem>>, vector<32x64xf32>
    %cst_26 = arith.constant dense<0.000000e+00> : vector<8x64xf32>
    %34 = tpu.matmul %32, %33, %cst_26 {dimension_numbers = #tpu.dot_dimension_numbers<[1], [0], [0], [1], [0, 0, 1, 1], [], []>} : vector<8x32xf32>, vector<32x64xf32>, vector<8x64xf32> -> vector<8x64xf32>
    %35 = arith.addf %31, %34 : vector<8x64xf32>
    %c0_27 = arith.constant 0 : index
    %c0_28 = arith.constant 0 : index
    %36 = vector.load %arg9[%c0_27, %c0_28] : memref<1x64xf32, #tpu.memory_space<vmem>>, vector<1x64xf32>
    %37 = vector.broadcast %36 : vector<1x64xf32> to vector<8x64xf32>
    %38 = arith.addf %35, %37 : vector<8x64xf32>
    %cst_29 = arith.constant 0.000000e+00 : f32
    %39 = vector.broadcast %cst_29 : f32 to vector<8x64xf32>
    %40 = arith.maximumf %38, %39 : vector<8x64xf32>
    %c0_30 = arith.constant 0 : index
    %c0_31 = arith.constant 0 : index
    %41 = vector.load %arg10[%c0_30, %c0_31] : memref<64x4xf32, #tpu.memory_space<vmem>>, vector<64x4xf32>
    %cst_32 = arith.constant dense<0.000000e+00> : vector<8x4xf32>
    %42 = tpu.matmul %40, %41, %cst_32 {dimension_numbers = #tpu.dot_dimension_numbers<[1], [0], [0], [1], [0, 0, 1, 1], [], []>} : vector<8x64xf32>, vector<64x4xf32>, vector<8x4xf32> -> vector<8x4xf32>
    %c0_33 = arith.constant 0 : index
    %c0_34 = arith.constant 0 : index
    %43 = vector.load %arg11[%c0_33, %c0_34] : memref<1x4xf32, #tpu.memory_space<vmem>>, vector<1x4xf32>
    %44 = vector.broadcast %43 : vector<1x4xf32> to vector<8x4xf32>
    %45 = arith.addf %42, %44 : vector<8x4xf32>
    %46 = arith.negf %45 : vector<8x4xf32>
    %47 = math.exp %46 : vector<8x4xf32>
    %cst_35 = arith.constant 1.000000e+00 : f32
    %48 = vector.broadcast %cst_35 : f32 to vector<8x4xf32>
    %49 = arith.addf %48, %47 : vector<8x4xf32>
    %50 = arith.divf %48, %49 : vector<8x4xf32>
    %c0_i32 = arith.constant 0 : i32
    %51 = arith.cmpi eq, %arg1, %c0_i32 : i32
    %52 = arith.extui %51 : i1 to i32
    %c0_i32_36 = arith.constant 0 : i32
    %53 = arith.cmpi ne, %52, %c0_i32_36 : i32
    scf.if %53 {
      %cst_56 = arith.constant 0xFF800000 : f32
      %87 = vector.broadcast %cst_56 : f32 to vector<4x16xf32>
      %c0_57 = arith.constant 0 : index
      %c0_58 = arith.constant 0 : index
      %88 = vector.load %arg12[%c0_57, %c0_58] : memref<4x16xf32, #tpu.memory_space<vmem>>, vector<4x16xf32>
      tpu.vector_store %arg12[%c0_57, %c0_58], %87 {strides = array<i32>} : memref<4x16xf32, #tpu.memory_space<vmem>>, vector<4x16xf32>,
    } else {
    }
    %c0_37 = arith.constant 0 : index
    %c0_38 = arith.constant 0 : index
    %54 = vector.load %arg3[%c0_37, %c0_38] : memref<8x16xf32, #tpu.memory_space<vmem>>, vector<8x16xf32>
    %55 = vector.extract_strided_slice %50 {offsets = [0, 0], sizes = [8, 1], strides = [1, 1]} : vector<8x4xf32> to vector<8x1xf32>
    %56 = vector.broadcast %55 : vector<8x1xf32> to vector<8x16xf32>
    %57 = arith.mulf %54, %56 : vector<8x16xf32>
    %cst_39 = arith.constant dense<0xFF800000> : vector<16xf32>
    %58 = vector.multi_reduction <maximumf>, %57, %cst_39 [0] : vector<8x16xf32> to vector<16xf32>
    %59 = vector.shape_cast %58 : vector<16xf32> to vector<1x16xf32>
    %c0_40 = arith.constant 0 : index
    %c0_41 = arith.constant 0 : index
    %60 = vector.load %arg12[%c0_40, %c0_41] : memref<4x16xf32, #tpu.memory_space<vmem>>, vector<1x16xf32>
    %61 = arith.maximumf %60, %59 : vector<1x16xf32>
    %c0_42 = arith.constant 0 : index
    %c0_43 = arith.constant 0 : index
    %62 = vector.load %arg12[%c0_42, %c0_43] : memref<4x16xf32, #tpu.memory_space<vmem>>, vector<1x16xf32>
    tpu.vector_store %arg12[%c0_42, %c0_43], %61 {strides = array<i32>} : memref<4x16xf32, #tpu.memory_space<vmem>>, vector<1x16xf32>,
    %63 = vector.extract_strided_slice %50 {offsets = [0, 1], sizes = [8, 1], strides = [1, 1]} : vector<8x4xf32> to vector<8x1xf32>
    %64 = vector.broadcast %63 : vector<8x1xf32> to vector<8x16xf32>
    %65 = arith.mulf %54, %64 : vector<8x16xf32>
    %cst_44 = arith.constant dense<0xFF800000> : vector<16xf32>
    %66 = vector.multi_reduction <maximumf>, %65, %cst_44 [0] : vector<8x16xf32> to vector<16xf32>
    %67 = vector.shape_cast %66 : vector<16xf32> to vector<1x16xf32>
    %c1 = arith.constant 1 : index
    %c0_45 = arith.constant 0 : index
    %68 = vector.load %arg12[%c1, %c0_45] : memref<4x16xf32, #tpu.memory_space<vmem>>, vector<1x16xf32>
    %69 = arith.maximumf %68, %67 : vector<1x16xf32>
    %c1_46 = arith.constant 1 : index
    %c0_47 = arith.constant 0 : index
    %70 = vector.load %arg12[%c1_46, %c0_47] : memref<4x16xf32, #tpu.memory_space<vmem>>, vector<1x16xf32>
    tpu.vector_store %arg12[%c1_46, %c0_47], %69 {strides = array<i32>} : memref<4x16xf32, #tpu.memory_space<vmem>>, vector<1x16xf32>,
    %71 = vector.extract_strided_slice %50 {offsets = [0, 2], sizes = [8, 1], strides = [1, 1]} : vector<8x4xf32> to vector<8x1xf32>
    %72 = vector.broadcast %71 : vector<8x1xf32> to vector<8x16xf32>
    %73 = arith.mulf %54, %72 : vector<8x16xf32>
    %cst_48 = arith.constant dense<0xFF800000> : vector<16xf32>
    %74 = vector.multi_reduction <maximumf>, %73, %cst_48 [0] : vector<8x16xf32> to vector<16xf32>
    %75 = vector.shape_cast %74 : vector<16xf32> to vector<1x16xf32>
    %c2 = arith.constant 2 : index
    %c0_49 = arith.constant 0 : index
    %76 = vector.load %arg12[%c2, %c0_49] : memref<4x16xf32, #tpu.memory_space<vmem>>, vector<1x16xf32>
    %77 = arith.maximumf %76, %75 : vector<1x16xf32>
    %c2_50 = arith.constant 2 : index
    %c0_51 = arith.constant 0 : index
    %78 = vector.load %arg12[%c2_50, %c0_51] : memref<4x16xf32, #tpu.memory_space<vmem>>, vector<1x16xf32>
    tpu.vector_store %arg12[%c2_50, %c0_51], %77 {strides = array<i32>} : memref<4x16xf32, #tpu.memory_space<vmem>>, vector<1x16xf32>,
    %79 = vector.extract_strided_slice %50 {offsets = [0, 3], sizes = [8, 1], strides = [1, 1]} : vector<8x4xf32> to vector<8x1xf32>
    %80 = vector.broadcast %79 : vector<8x1xf32> to vector<8x16xf32>
    %81 = arith.mulf %54, %80 : vector<8x16xf32>
    %cst_52 = arith.constant dense<0xFF800000> : vector<16xf32>
    %82 = vector.multi_reduction <maximumf>, %81, %cst_52 [0] : vector<8x16xf32> to vector<16xf32>
    %83 = vector.shape_cast %82 : vector<16xf32> to vector<1x16xf32>
    %c3 = arith.constant 3 : index
    %c0_53 = arith.constant 0 : index
    %84 = vector.load %arg12[%c3, %c0_53] : memref<4x16xf32, #tpu.memory_space<vmem>>, vector<1x16xf32>
    %85 = arith.maximumf %84, %83 : vector<1x16xf32>
    %c3_54 = arith.constant 3 : index
    %c0_55 = arith.constant 0 : index
    %86 = vector.load %arg12[%c3_54, %c0_55] : memref<4x16xf32, #tpu.memory_space<vmem>>, vector<1x16xf32>
    tpu.vector_store %arg12[%c3_54, %c0_55], %85 {strides = array<i32>} : memref<4x16xf32, #tpu.memory_space<vmem>>, vector<1x16xf32>,
    return
  }
  func.func @transform_0(%arg0: i32, %arg1: i32) -> (i32, i32) {
    %c0_i32 = arith.constant 0 : i32
    %c0_i32_0 = arith.constant 0 : i32
    return %arg1, %c0_i32 : i32, i32
  }
  func.func @transform_1(%arg0: i32, %arg1: i32) -> (i32, i32) {
    %c0_i32 = arith.constant 0 : i32
    return %arg1, %arg0 : i32, i32
  }
  func.func @transform_2(%arg0: i32, %arg1: i32) -> (i32, i32) {
    %c0_i32 = arith.constant 0 : i32
    %c0_i32_0 = arith.constant 0 : i32
    %c0_i32_1 = arith.constant 0 : i32
    return %c0_i32, %c0_i32_0 : i32, i32
  }
  func.func @transform_3(%arg0: i32, %arg1: i32) -> (i32, i32) {
    %c0_i32 = arith.constant 0 : i32
    %c0_i32_0 = arith.constant 0 : i32
    %c0_i32_1 = arith.constant 0 : i32
    return %c0_i32, %c0_i32_0 : i32, i32
  }
  func.func @transform_4(%arg0: i32, %arg1: i32) -> (i32, i32) {
    %c0_i32 = arith.constant 0 : i32
    %c0_i32_0 = arith.constant 0 : i32
    return %arg1, %c0_i32 : i32, i32
  }
  func.func @transform_5(%arg0: i32, %arg1: i32) -> (i32, i32) {
    %c0_i32 = arith.constant 0 : i32
    %c0_i32_0 = arith.constant 0 : i32
    return %arg1, %c0_i32 : i32, i32
  }
  func.func @transform_6(%arg0: i32, %arg1: i32) -> (i32, i32) {
    %c0_i32 = arith.constant 0 : i32
    %c0_i32_0 = arith.constant 0 : i32
    %c0_i32_1 = arith.constant 0 : i32
    return %c0_i32, %c0_i32_0 : i32, i32
  }
  func.func @transform_7(%arg0: i32, %arg1: i32) -> (i32, i32) {
    %c0_i32 = arith.constant 0 : i32
    %c0_i32_0 = arith.constant 0 : i32
    %c0_i32_1 = arith.constant 0 : i32
    return %c0_i32, %c0_i32_0 : i32, i32
  }
  func.func @transform_8(%arg0: i32, %arg1: i32) -> (i32, i32) {
    %c0_i32 = arith.constant 0 : i32
    %c0_i32_0 = arith.constant 0 : i32
    %c0_i32_1 = arith.constant 0 : i32
    return %c0_i32, %c0_i32_0 : i32, i32
  }
  func.func @transform_9(%arg0: i32, %arg1: i32) -> (i32, i32) {
    %c0_i32 = arith.constant 0 : i32
    %c0_i32_0 = arith.constant 0 : i32
    %c0_i32_1 = arith.constant 0 : i32
    return %c0_i32, %c0_i32_0 : i32, i32
  }
  func.func @transform_10(%arg0: i32, %arg1: i32) -> (i32, i32) {
    %c0_i32 = arith.constant 0 : i32
    %c0_i32_0 = arith.constant 0 : i32
    return %c0_i32, %arg0 : i32, i32
  }
}

</mosaic_0001>

<bundles_post_ra>
// kernel: tpu_custom_call.1
= control target key start
LH: loop header
LB: loop body
LE: loop exit
PB: predicated region body
PF: predicated region fallthrough
CT: control target
= control target key end

     0   :  { %15 = vsyncpa [#allocation3], 0  ;;  %s1838_s13 = smov 0   ;;  %s1840_s14 = smov 0   ;;  %s2133_s0 = inlined_call_operand.vmem [shape: f32[32,16], index: 0, kind: input, shape index: {}]   ;;  %s2134_s1 = inlined_call_operand.vmem [shape: f32[32,16], index: 1, kind: input, shape index: {}]   ;;  %s2135_s2 = inlined_call_operand.vmem [shape: f32[16,32], index: 2, kind: input, shape index: {}]   ;;  %s2136_s3 = inlined_call_operand.vmem [shape: f32[16,32], index: 3, kind: input, shape index: {}]   ;;  %s2137_s4 = inlined_call_operand.vmem [shape: f32[32,32], index: 4, kind: input, shape index: {}]   ;;  %s2138_s5 = inlined_call_operand.vmem [shape: f32[32,32], index: 5, kind: input, shape index: {}]   ;;  %s2139_s6 = inlined_call_operand.vmem [shape: f32[256,64], index: 6, kind: input, shape index: {}]   ;;  %s2140_s7 = inlined_call_operand.vmem [shape: f32[1,64], index: 7, kind: input, shape index: {}]   ;;  %s2141_s8 = inlined_call_operand.vmem [shape: f32[64,4], index: 8, kind: input, shape index: {}]   ;;  %s2142_s9 = inlined_call_operand.vmem [shape: f32[1,4], index: 9, kind: input, shape index: {}]   ;;  %s2143_s10 = inlined_call_operand.hbm [shape: f32[4,16], index: 10, kind: output, shape index: {}]  }
   0x1   :  { %s1842_s15 = smov 0  }
   0x2 LB: > { %s1473_s16 = sadd.s32 4294967295, %s1773_s15   ;;  %s30_s17 = sadd.s32 1, %s1769_s14  ;;  %s1773_s15 = sphi %s1842_s15, %s21_s15   ;;  %s1769_s14 = sphi %s1840_s14, %s2146_s14   ;;  %s1765_s13 = sphi %s1838_s13, %s2145_s13  }
   0x3   : > { %p31_p0 = scmp.ge.s32.totalorder %s30_s17, 4  ;;  %p1476_p1 = scmp.ge.s32.totalorder %s1773_s15, 1 }
   0x4   : > { %p356_p2 = scmp.lt.s32.totalorder %s1773_s15, 5 }
   0x5   : > { %s2148_s17 = smov (%p31_p0, %s30_s17), 0 }
   0x6   : > { %p357_p3 = pnand %p1476_p1, %p356_p2 }
   0x7   : > { %p403_p4 = scmp.lt.s32.totalorder (!%p357_p3), %s1765_s13, 3  ;;  %p1495_p5 = scmp.ne.s32.totalorder (!%p357_p3), %s1765_s13, 0 }
   0x8   : > { %360 = sbr.rel (%p357_p3) target bundleno = 826 (0x33a), region = 60 }
   0xd   : > { %v424_v0 = vld [vmem:[%s2135_s2 + $0x8] sm:$0xff]  ;;  %v1775_v2 = vmov 0.0   ;;  %v423_v3 = vld [vmem:[%s2135_s2] sm:$0xff]  ;;  %s404_s26 = scalar_select %p403_p4, %s1765_s13, 3  ;;  %vm1776_vm0 = vmmov 0   ;;  %vm425_vm1 = vcmask 130048  }
   0xe   : > { %v500_v1 = vld [vmem:[%s2136_s3 + $0x8] sm:$0xff]  ;;  %1555 = vmatprep.subr.mxu0 %v1775_v2  ;;  %1562 = vmatprep.subr.mxu1 %v1775_v2  ;;  %v499_v4 = vld [vmem:[%s2136_s3] sm:$0xff]  ;;  %v580_v5 = vld [vmem:[%s2139_s6 + $0x38] sm:$0xff]  ;;  %vm581_vm2 = vcmask 261120   ;;  %vm1226_vm3 = vcmask 523264  }
   0xf   : > { %1556 = vmatpush3.msra.mxu0 %v424_v0  ;;  %1563 = vmatpush3.msra.mxu1 %v500_v1  ;;  %s1879_s27 = sshll.u32 %s404_s26, 3  ;;  %v579_v7 = vld [vmem:[%s2139_s6 + $0x30] sm:$0xff]  ;;  %v578_v8 = vld [vmem:[%s2139_s6 + $0x28] sm:$0xff]  ;;  %v577_v9 = vld [vmem:[%s2139_s6 + $0x20] sm:$0xff] }
  0x10   : > { %1557 = vmatprep.subr.mxu0 %v1775_v2  ;;  %1564 = vmatprep.subr.mxu1 %v1775_v2  ;;  %s406_s30 = scalar_lea.vmem %s2133_s0, %s1879_s27  ;;  %s413_s18 = scalar_lea.vmem %s2134_s1, %s1879_s27  ;;  %v731_v10 = vld [vmem:[%s2139_s6 + $0x58] sm:$0xff]  ;;  %v730_v11 = vld [vmem:[%s2139_s6 + $0x50] sm:$0xff]  ;;  %v729_v12 = vld [vmem:[%s2139_s6 + $0x48] sm:$0xff] }
  0x11   : > { %1558 = vmatpush3.msra.mxu0 %v423_v3  ;;  %1559 = vmatprep.mubr.msk.f32.mxu0 %vm1776_vm0, %v1775_v2  ;;  %v422_v6 = vld [vmem:[%s406_s30] sm:$0xff]  ;;  %s417_s22 = scalar_lea.vmem %s2137_s4, %s1879_s27  ;;  %s421_s28 = scalar_lea.vmem %s2138_s5, %s1879_s27  ;;  %v889_v17 = vld [vmem:[%s2139_s6 + $0x98] sm:$0xff]  ;;  %v888_v18 = vld [vmem:[%s2139_s6 + $0x90] sm:$0xff] }
  0x12   : > { %1565 = vmatpush3.msra.mxu1 %v499_v4  ;;  %1566 = vmatprep.mubr.msk.f32.mxu1 %vm1776_vm0, %v1775_v2  ;;  %v728_v13 = vld [vmem:[%s2139_s6 + $0x40] sm:$0xff]  ;;  %v887_v20 = vld [vmem:[%s2139_s6 + $0x88] sm:$0xff]  ;;  %v1048_v22 = vld [vmem:[%s2139_s6 + $0xd8] sm:$0xff] }
  0x13   : > { %1569 = vmatprep.subr.mxu1 %v1775_v2  ;;  %1591 = vmatprep.subr.mxu0 %v1775_v2  ;;  %v571_v14 = vld [vmem:[%s417_s22] sm:$0xff]  ;;  %v1047_v23 = vld [vmem:[%s2139_s6 + $0xd0] sm:$0xff]  ;;  %v1046_v25 = vld [vmem:[%s2139_s6 + $0xc8] sm:$0xff] }
  0x14   : > { %1560 = vmatmul.mubr.msk.f32.vlgmr.msra.gmra.mxu0 %vm425_vm1, %v422_v6  ;;  %1567 = vmatmul.mubr.msk.f32.vlgmr.msra.gmra.mxu1 %vm425_vm1, %v422_v6  ;;  %v572_v15 = vld [vmem:[%s421_s28] sm:$0xff]  ;;  %v576_v27 = vld [vmem:[%s2139_s6 + $0x18] sm:$0xff]  ;;  %v575_v30 = vld [vmem:[%s2139_s6 + $0x10] sm:$0xff] }
  0x15   : > { %1570 = vmatpush3.msra.mxu1 %v580_v5  ;;  %1577 = vmatprep.mubr.msk.f32.mxu1 %vm1776_vm0, %v1775_v2  ;;  %v884_v16 = vsub.f32 %v571_v14, %v572_v15  ;;  %v886_v21 = vld [vmem:[%s2139_s6 + $0x80] sm:$0xff]  ;;  %v1044_v24 = vmul.f32 %v572_v15, %v571_v14  ;;  %v574_v33 = vld [vmem:[%s2139_s6 + $0x8] sm:$0xff]  ;;  %v809_v35 = vld [vmem:[%s2139_s6 + $0x78] sm:$0xff] }
  0x16   : > { %1571 = vmatprep.subr.mxu1 %v1775_v2  ;;  %1599 = vmatprep.mubr.msk.f32.mxu0 %vm1776_vm0, %v1775_v2  ;;  %v1045_v26 = vld [vmem:[%s2139_s6 + $0xc0] sm:$0xff]  ;;  %v808_v36 = vld [vmem:[%s2139_s6 + $0x70] sm:$0xff]  ;;  %v807_v37 = vld [vmem:[%s2139_s6 + $0x68] sm:$0xff] }
  0x17   : > { %1572 = vmatpush3.msra.mxu1 %v579_v7  ;;  %1592 = vmatpush3.msra.mxu0 %v731_v10  ;;  %v885_v19 = vand.u32 2147483647, %v884_v16  ;;  %v573_v34 = vld [vmem:[%s2139_s6] sm:$0xff]  ;;  %v969_v39 = vld [vmem:[%s2139_s6 + $0xb8] sm:$0xff]  ;;  %v968_v40 = vld [vmem:[%s2139_s6 + $0xb0] sm:$0xff] }
  0x18   : > { %1573 = vmatprep.subr.mxu1 %v1775_v2  ;;  %1593 = vmatprep.subr.mxu0 %v1775_v2  ;;  %v806_v38 = vld [vmem:[%s2139_s6 + $0x60] sm:$0xff]  ;;  %v967_v42 = vld [vmem:[%s2139_s6 + $0xa8] sm:$0xff]  ;;  %v1127_v45 = vld [vmem:[%s2139_s6 + $0xf8] sm:$0xff] }
  0x19   : > { %1574 = vmatpush3.msra.mxu1 %v578_v8  ;;  %1594 = vmatpush3.msra.mxu0 %v730_v11  ;;  %v966_v43 = vld [vmem:[%s2139_s6 + $0xa0] sm:$0xff]  ;;  %v1126_v46 = vld [vmem:[%s2139_s6 + $0xf0] sm:$0xff]  ;;  %v1125_v47 = vld [vmem:[%s2139_s6 + $0xe8] sm:$0xff] }
  0x1a   : > { %1575 = vmatprep.subr.mxu1 %v1775_v2  ;;  %1595 = vmatprep.subr.mxu0 %v1775_v2  ;;  %v1124_v48 = vld [vmem:[%s2139_s6 + $0xe0] sm:$0xff]  ;;  %v1218_v54 = vld [vmem:[%s2141_s8 + $0x38] sm:$0xff]  ;;  %v1217_v55 = vld [vmem:[%s2141_s8 + $0x30] sm:$0xff] }
  0x1b   : > { %1576 = vmatpush3.msra.mxu1 %v577_v9  ;;  %1596 = vmatpush3.msra.mxu0 %v729_v12  ;;  %v1216_v57 = vld [vmem:[%s2141_s8 + $0x28] sm:$0xff]  ;;  %v1215_v58 = vld [vmem:[%s2141_s8 + $0x20] sm:$0xff]  ;;  %v1214_v60 = vld [vmem:[%s2141_s8 + $0x18] sm:$0xff] }
  0x1c   : > { %1580 = vmatprep.subr.mxu1 %v1775_v2  ;;  %1597 = vmatprep.subr.mxu0 %v1775_v2  ;;  %v1213_v61 = vld [vmem:[%s2141_s8 + $0x10] sm:$0xff]  ;;  %v1212_v62 = vld [vmem:[%s2141_s8 + $0x8] sm:$0xff]  ;;  %v1211_v63 = vld [vmem:[%s2141_s8] sm:$0xff] }
  0x1d   : > { %1598 = vmatpush3.msra.mxu0 %v728_v13 }
  0x1e   : > { %1600 = vmatmul.mubr.msk.f32.vlgmr.msra.gmra.mxu0 %vm581_vm2, %v572_v15  ;;  %1613 = vmatprep.subr.mxu0 %v1775_v2  ;;  %v1491_v15 = vld [vmem:[%s2140_s7] ss:$0 sm:$0xff] }
  0x1f   : > { %1614 = vmatpush3.msra.mxu0 %v889_v17  ;;  %1621 = vmatprep.mubr.msk.f32.mxu0 %vm1776_vm0, %v1775_v2 }
  0x20   : > { %1615 = vmatprep.subr.mxu0 %v1775_v2 }
  0x21   : > { %1616 = vmatpush3.msra.mxu0 %v888_v18 }
  0x22   : > { %1617 = vmatprep.subr.mxu0 %v1775_v2 }
  0x23   : > { %1618 = vmatpush3.msra.mxu0 %v887_v20  ;;  %v1492_v20 = vld [vmem:[%s2142_s9] ss:$0 sm:$0xff] }
  0x24   : > { %1619 = vmatprep.subr.mxu0 %v1775_v2 }
  0x25   : > { %1620 = vmatpush3.msra.mxu0 %v886_v21 }
  0x26   : > { %1622 = vmatmul.mubr.msk.f32.vlgmr.msra.gmra.mxu0 %vm581_vm2, %v885_v19  ;;  %1635 = vmatprep.subr.mxu0 %v1775_v2 }
  0x27   : > { %1636 = vmatpush3.msra.mxu0 %v1048_v22  ;;  %1643 = vmatprep.mubr.msk.f32.mxu0 %vm1776_vm0, %v1775_v2 }
  0x28   : > { %1637 = vmatprep.subr.mxu0 %v1775_v2 }
  0x29   : > { %1638 = vmatpush3.msra.mxu0 %v1047_v23 }
  0x2a   : > { %1639 = vmatprep.subr.mxu0 %v1775_v2 }
  0x2b   : > { %1640 = vmatpush3.msra.mxu0 %v1046_v25 }
  0x2c   : > { %1641 = vmatprep.subr.mxu0 %v1775_v2 }
  0x2d   : > { %1642 = vmatpush3.msra.mxu0 %v1045_v26 }
  0x2e   : > { %1644 = vmatmul.mubr.msk.f32.vlgmr.msra.gmra.mxu0 %vm581_vm2, %v1044_v24  ;;  %1657 = vmatprep.subr.mxu0 %v1775_v2 }
  0x2f   : > { %1673 = vmatprep.mubr.msk.f32.mxu0 %vm1776_vm0, %v1775_v2  ;;  %1658 = vmatpush3.msra.mxu0 %v1218_v54 }
  0x30   : > { %1659 = vmatprep.subr.mxu0 %v1775_v2 }
  0x31   : > { %1660 = vmatpush3.msra.mxu0 %v1217_v55 }
  0x32   : > { %1661 = vmatprep.subr.mxu0 %v1775_v2 }
  0x33   : > { %1662 = vmatpush3.msra.mxu0 %v1216_v57 }
  0x34   : > { %1663 = vmatprep.subr.mxu0 %v1775_v2 }
  0x35   : > { %1664 = vmatpush3.msra.mxu0 %v1215_v58 }
  0x36   : > { %1665 = vmatprep.subr.mxu0 %v1775_v2 }
  0x37   : > { %1666 = vmatpush3.msra.mxu0 %v1214_v60 }
  0x38   : > { %1667 = vmatprep.subr.mxu0 %v1775_v2 }
  0x39   : > { %1668 = vmatpush3.msra.mxu0 %v1213_v61 }
  0x3a   : > { %1669 = vmatprep.subr.mxu0 %v1775_v2 }
  0x3b   : > { %1670 = vmatpush3.msra.mxu0 %v1212_v62 }
  0x3c   : > { %1671 = vmatprep.subr.mxu0 %v1775_v2 }
  0x3d   : > { %1672 = vmatpush3.msra.mxu0 %v1211_v63 }
  0xd4   : > { %v495_v28 = vpop.f32.mrf.mxu0  ;;  %v567_v29 = vpop.f32.mrf.mxu1 }
  0xd5   : > { %1578 = vmatmul.mubr.msk.f32.vlgmr.msra.gmra.mxu1 %vm581_vm2, %v495_v28  ;;  %v964_v41 = vsub.f32 %v495_v28, %v567_v29  ;;  %v1123_v49 = vmul.f32 %v567_v29, %v495_v28 }
  0xd6   : > { %1581 = vmatpush3.msra.mxu1 %v576_v27  ;;  %v1561_v31 = vpop.f32.mrf.mxu0  ;;  %1588 = vmatprep.mubr.msk.f32.mxu1 %vm1776_vm0, %v1775_v2  ;;  %v1568_v32 = vpop.f32.mrf.mxu1 }
  0xd7   : > { %1582 = vmatprep.subr.mxu1 %v1775_v2  ;;  %v965_v44 = vand.u32 2147483647, %v964_v41 }
  0xd8   : > { %1583 = vmatpush3.msra.mxu1 %v575_v30 }
  0xd9   : > { %1584 = vmatprep.subr.mxu1 %v1775_v2 }
  0xda   : > { %1585 = vmatpush3.msra.mxu1 %v574_v33 }
  0xdb   : > { %1586 = vmatprep.subr.mxu1 %v1775_v2 }
  0xdc   : > { %1587 = vmatpush3.msra.mxu1 %v573_v34 }
  0xdd   : > { %1589 = vmatmul.mubr.msk.f32.vlgmr.msra.gmra.mxu1 %vm581_vm2, %v571_v14  ;;  %1602 = vmatprep.subr.mxu1 %v1775_v2 }
  0xde   : > { %1603 = vmatpush3.msra.mxu1 %v809_v35  ;;  %1610 = vmatprep.mubr.msk.f32.mxu1 %vm1776_vm0, %v1775_v2  ;;  %v801_v50 = vpop.f32.mrf.mxu0 }
  0xdf   : > { %1604 = vmatprep.subr.mxu1 %v1775_v2 }
  0xe0   : > { %1605 = vmatpush3.msra.mxu1 %v808_v36  ;;  %v1601_v51 = vpop.f32.mrf.mxu0 }
  0xe1   : > { %1606 = vmatprep.subr.mxu1 %v1775_v2 }
  0xe2   : > { %1607 = vmatpush3.msra.mxu1 %v807_v37 }
  0xe3   : > { %1608 = vmatprep.subr.mxu1 %v1775_v2 }
  0xe4   : > { %1609 = vmatpush3.msra.mxu1 %v806_v38 }
  0xe5   : > { %1611 = vmatmul.mubr.msk.f32.vlgmr.msra.gmra.mxu1 %vm581_vm2, %v567_v29  ;;  %1624 = vmatprep.subr.mxu1 %v1775_v2 }
  0xe6   : > { %1625 = vmatpush3.msra.mxu1 %v969_v39  ;;  %1632 = vmatprep.mubr.msk.f32.mxu1 %vm1776_vm0, %v1775_v2  ;;  %v959_v52 = vpop.f32.mrf.mxu0 }
  0xe7   : > { %1626 = vmatprep.subr.mxu1 %v1775_v2 }
  0xe8   : > { %1627 = vmatpush3.msra.mxu1 %v968_v40  ;;  %v1623_v53 = vpop.f32.mrf.mxu0 }
  0xe9   : > { %1628 = vmatprep.subr.mxu1 %v1775_v2 }
  0xea   : > { %1629 = vmatpush3.msra.mxu1 %v967_v42 }
  0xeb   : > { %1630 = vmatprep.subr.mxu1 %v1775_v2 }
  0xec   : > { %1631 = vmatpush3.msra.mxu1 %v966_v43 }
  0xed   : > { %1633 = vmatmul.mubr.msk.f32.vlgmr.msra.gmra.mxu1 %vm581_vm2, %v965_v44  ;;  %1646 = vmatprep.subr.mxu1 %v1775_v2 }
  0xee   : > { %1647 = vmatpush3.msra.mxu1 %v1127_v45  ;;  %1654 = vmatprep.mubr.msk.f32.mxu1 %vm1776_vm0, %v1775_v2  ;;  %v1118_v56 = vpop.f32.mrf.mxu0 }
  0xef   : > { %1648 = vmatprep.subr.mxu1 %v1775_v2 }
  0xf0   : > { %1649 = vmatpush3.msra.mxu1 %v1126_v46  ;;  %v1645_v59 = vpop.f32.mrf.mxu0 }
  0xf1   : > { %1650 = vmatprep.subr.mxu1 %v1775_v2 }
  0xf2   : > { %1651 = vmatpush3.msra.mxu1 %v1125_v47 }
  0xf3   : > { %1652 = vmatprep.subr.mxu1 %v1775_v2 }
  0xf4   : > { %1653 = vmatpush3.msra.mxu1 %v1124_v48 }
  0xf5   : > { %1655 = vmatmul.mubr.msk.f32.vlgmr.msra.gmra.mxu1 %vm581_vm2, %v1123_v49 }
 0x195   : > { %v651_v0 = vpop.f32.mrf.mxu1 }
 0x197   : > { %v1579_v1 = vpop.f32.mrf.mxu1 }
 0x19d   : > { %v724_v3 = vpop.f32.mrf.mxu1 }
 0x19e   : > { %v725_v5 = vadd.f32 %v724_v3, %v651_v0 }
 0x19f   : > { %v1590_v4 = vpop.f32.mrf.mxu1 }
 0x1a0   : > { %v805_v8 = vadd.f32 %v801_v50, %v725_v5 }
 0x1a5   : > { %v879_v6 = vpop.f32.mrf.mxu1 }
 0x1a6   : > { %v883_v9 = vadd.f32 %v879_v6, %v805_v8 }
 0x1a7   : > { %v1612_v7 = vpop.f32.mrf.mxu1 }
 0x1a8   : > { %v963_v11 = vadd.f32 %v959_v52, %v883_v9 }
 0x1ad   : > { %v1039_v10 = vpop.f32.mrf.mxu1 }
 0x1ae   : > { %v1043_v13 = vadd.f32 %v1039_v10, %v963_v11 }
 0x1af   : > { %v1634_v12 = vpop.f32.mrf.mxu1 }
 0x1b0   : > { %v1122_v14 = vadd.f32 %v1118_v56, %v1043_v13 }
 0x1b5   : > { %v1197_v2 = vpop.f32.mrf.mxu1 }
 0x1b6   : > { %v1201_v16 = vadd.f32 %v1197_v2, %v1122_v14 }
 0x1b7   : > { %v1656_v17 = vpop.f32.mrf.mxu1 }
 0x1b8   : > { %v1209_v18 = vadd.f32 %v1491_v15, %v1201_v16 }
 0x1ba   : > { %v1210_v19 = vmax.f32 %v1209_v18, 0.0 }
 0x1bc   : > { %1674 = vmatmul.mubr.msk.f32.vlgmr.msra.gmra.mxu0 %vm1226_vm3, %v1210_v19 }
 0x27c   : > { %v1296_v21 = vpop.f32.mrf.mxu0 }
 0x27d   : > { %v1297_v22 = vadd.f32 %v1492_v20, %v1296_v21 }
 0x27e   : > { %v1675_v23 = vpop.f32.mrf.mxu0 }
 0x27f   : > { %v1494_v24 = vmul.f32 -1.442695, %v1297_v22 }
 0x281   : > { %1714 = vpow2.f32 %v1494_v24 }
 0x28e   : > { %v1715_v25 = vpop.eup %1714 }
 0x28f   : > { %v1303_v26 = vadd.f32 1.0, %v1715_v25 }
 0x291   : > { %1716 = vrcp.f32 %v1303_v26 }
 0x29a   : > { %1309 = sbr.rel (%p1495_p5) target bundleno = 673 (0x2a1), region = 64 }
 0x29e   : > { %v1717_v27 = vpop.eup %1716 }
 0x29f   : > { %vm1310_vm4 = vcmask 125952   ;;  %v1777_v28 = vmov -inf  }
 0x2a0   : > { %1311 = vst.msk [vmem:[#allocation2] sm:$0xf] %vm1310_vm4, %v1777_v28 }
 0x2a1 PF: > { %v1778_v29 = vmov 2   ;;  %v1779_v30 = vmov 0   ;;  %v1780_v31 = vmov 3   ;;  %v1781_v32 = vmov 1   ;;  %v1312_v33 = vld [vmem:[%s413_s18] sm:$0xff]  ;;  %s1782_s27 = smov [#allocation2]  }
 0x2a2   : > { %1720 = vset.pattern.permute.xlu1 %v1778_v29  ;;  %1718 = vset.pattern.permute.xlu0 %v1779_v30  ;;  %vm1328_vm5 = vcmask 122880   ;;  %s1384_s18 = sshll.u32 %s1782_s27, 4  ;;  %p2107_p6 = scmp.eq.s32.totalorder %s1473_s16, 3  ;;  %s1385_s18 = int_to_ptr.vmem [resolvable:$true] %s1384_s18 }
 0x2a3   : > { %1346 = vperm.xlu1 %1720, %v1717_v27   ;;  %1315 = vperm.xlu0 %1718, %v1717_v27   ;;  %s1723_s20 = scalar_lea.vmem %s1385_s18, 64  ;;  %p1730_p10 = scmp.lt.s32.totalorder %s1385_s18, %s1385_s18 }
 0x2a4   : > { %p1724_p7 = scmp.ne.s32.totalorder %s1385_s18, %s1723_s20  ;;  %p1731_p11 = scmp.lt.s32.totalorder %s1723_s20, %s1723_s20 }
 0x2a6   : > { %p1725_p8 = pnand %p1724_p7, %p2107_p6  ;;  %p1732_p12 = por %p1731_p11, %p1730_p10 }
 0x2a7   : > { %1721 = vset.pattern.permute.xlu1 %v1780_v31  ;;  %1719 = vset.pattern.permute.xlu0 %v1781_v32  ;;  %v1357_v60 = vld [vmem:[#allocation2 + $0x2] sm:$0x1]  ;;  %v1326_v61 = vld [vmem:[#allocation2] sm:$0x1]  ;;  %v1372_v9 = vld [vmem:[#allocation2 + $0x3] sm:$0x1] }
 0x2a8   : > { %1361 = vperm.xlu1 %1721, %v1717_v27   ;;  %1331 = vperm.xlu0 %1719, %v1717_v27   ;;  %v1342_v10 = vld [vmem:[#allocation2 + $0x1] sm:$0x1]  ;;  %p1726_p9 = pneg %p1725_p8 }
 0x2aa   : > { %p1733_p13 = pnand %p1732_p12, %p1726_p9 }
 0x2ac   : > { %1722 = vset.pattern.permute.xlu0 %v1780_v31 }
 0x31e   : > { %v1347_v34 = vpop.permute.xlu1 %1346  ;;  %v1316_v35 = vpop.permute.xlu0 %1315 }
 0x31f   : > { %v1349_v36 = vmul.f32 %v1347_v34, %v1312_v33  ;;  %v1318_v37 = vmul.f32 %v1316_v35, %v1312_v33 }
 0x321   : > { %v1350_v38 = vsel %vm425_vm1, %v1349_v36, -inf  ;;  %v1319_v39 = vsel %vm425_vm1, %v1318_v37, -inf }
 0x322   : > { %v1351_v40 = vrot.slane %v1350_v38, 4  ;;  %v1320_v41 = vrot.slane %v1319_v39, 4 }
 0x323   : > { %v1362_v42 = vpop.permute.xlu1 %1361  ;;  %v1332_v43 = vpop.permute.xlu0 %1331 }
 0x324   : > { %v1352_v44 = vmax.f32 %v1350_v38, %v1351_v40  ;;  %v1321_v45 = vmax.f32 %v1319_v39, %v1320_v41  ;;  %v1364_v46 = vmul.f32 %v1362_v42, %v1312_v33  ;;  %v1334_v47 = vmul.f32 %v1332_v43, %v1312_v33 }
 0x326   : > { %v1353_v48 = vrot.slane %v1352_v44, 2  ;;  %v1322_v49 = vrot.slane %v1321_v45, 2  ;;  %v1365_v50 = vsel %vm425_vm1, %v1364_v46, -inf  ;;  %v1335_v51 = vsel %vm425_vm1, %v1334_v47, -inf }
 0x327   : > { %v1366_v52 = vrot.slane %v1365_v50, 4  ;;  %v1336_v53 = vrot.slane %v1335_v51, 4 }
 0x328   : > { %v1354_v54 = vmax.f32 %v1352_v44, %v1353_v48  ;;  %v1323_v55 = vmax.f32 %v1321_v45, %v1322_v49 }
 0x329   : > { %v1367_v56 = vmax.f32 %v1365_v50, %v1366_v52  ;;  %v1337_v57 = vmax.f32 %v1335_v51, %v1336_v53 }
 0x32a   : > { %v1355_v58 = vrot.slane %v1354_v54, 1  ;;  %v1324_v59 = vrot.slane %v1323_v55, 1 }
 0x32b   : > { %v1368_v62 = vrot.slane %v1367_v56, 2  ;;  %v1338_v63 = vrot.slane %v1337_v57, 2 }
 0x32c   : > { %v1356_v0 = vmax.f32 %v1354_v54, %v1355_v58  ;;  %v1325_v1 = vmax.f32 %v1323_v55, %v1324_v59 }
 0x32d   : > { %v1369_v3 = vmax.f32 %v1367_v56, %v1368_v62  ;;  %v1339_v4 = vmax.f32 %v1337_v57, %v1338_v63 }
 0x32e   : > { %v1358_v5 = vmax.f32 %v1357_v60, %v1356_v0  ;;  %v1327_v6 = vmax.f32 %v1326_v61, %v1325_v1 }
 0x32f   : > { %v1370_v7 = vrot.slane %v1369_v3, 1  ;;  %v1340_v8 = vrot.slane %v1339_v4, 1 }
 0x330   : > { %1329 = vst.msk [vmem:[#allocation2] sm:$0x1] %vm1328_vm5, %v1327_v6  ;;  %1359 = vst.msk [vmem:[#allocation2 + $0x2] sm:$0x1] %vm1328_vm5, %v1358_v5 }
 0x331   : > { %v1371_v11 = vmax.f32 %v1369_v3, %v1370_v7  ;;  %v1341_v12 = vmax.f32 %v1339_v4, %v1340_v8 }
 0x333   : > { %v1373_v13 = vmax.f32 %v1372_v9, %v1371_v11  ;;  %v1343_v14 = vmax.f32 %v1342_v10, %v1341_v12 }
 0x335   : > { %1344 = vst.msk [vmem:[#allocation2 + $0x1] sm:$0x1] %vm1328_vm5, %v1343_v14  ;;  %1374 = vst.msk [vmem:[#allocation2 + $0x3] sm:$0x1] %vm1328_vm5, %v1373_v13 }
 0x336   : > { %1736 = shalt.err (!%p1733_p13)
}
 0x337   : > { %1677 = dma.vmem_to_hbm [thread:$0]  (%p2107_p6), %s1385_s18, 64, %s2143_s10, [#allocation3]  }
 0x338   : > { %1760 = dma.done.wait (%p2107_p6), [#allocation3], 64  }
 0x339   : > { %1762 = vsyncadd (%p2107_p6), [#allocation3], 4294967232 }
 0x33a PF: > { %s21_s15 = sadd.s32 1, %s1773_s15   ;;  %s2145_s13 = smov %s1769_s14 }
 0x33b   : > { %p18_p0 = scmp.ge.s32.totalorder %s21_s15, 6   ;;  %s2146_s14 = smov %s2148_s17 }
 0x33d   :  { %20 = sbr.rel (!%p18_p0) target bundleno = 2 (0x2), region = 101 }
 0x342   :  { %1397 = vsyncpa [#allocation3], 1 }
 0x343   :  { %1399 = vsyncpa [#allocation3 + $0x1], 1 }

</bundles_post_ra>
